<compile_context>
chip_gen: v7x
topology: tpu7x:2x2x1
jax: 0.10.0
libtpu: 0.0.40
codegen_flags: <defaults>
</compile_context>

<pallas_src>
import jax
import jax.numpy as jnp
from jax import lax
from jax.experimental import pallas as pl
from jax.experimental.pallas import tpu as pltpu


_LANES = 128
_SUBLANES = 8


def _round_up(v, m):
    return ((v + m - 1) // m) * m


def _vmem_budget_bytes():
    """~87% of this generation's per-core VMEM (v5e/v6e: 128 MiB, v7x: 64 MiB)."""
    cap = 64 * 1024 * 1024
    try:
        info = pltpu.get_tpu_info()
        cap_attr = getattr(info, "vmem_capacity_bytes", None)
        if cap_attr:
            cap = int(cap_attr)
    except Exception:
        pass
    return int(cap * 0.87)


def _choose_panel_rows(n_pad, d_x, d_z, x_itemsize, z_itemsize, budget):
    """Largest multiple-of-8 row-panel that keeps ~5 live (bm, N) f32 panels in VMEM."""
    resident = 2 * n_pad * (d_x * x_itemsize + d_z * z_itemsize)  # x/z full (double-buffered)
    resident += 8 * n_pad * 4 + (2 << 20)                         # sq vectors + slack
    avail = budget - resident
    if avail <= 0:
        avail = budget // 4
    bm = avail // (5 * n_pad * 4)
    bm = (bm // _SUBLANES) * _SUBLANES
    bm = max(_SUBLANES, min(int(bm), n_pad, 512))
    return int(bm)


def _make_partials_kernel(n_true, n_pad, bm, needs_mask):
    """Kernel producing, per row panel, the 8 partial sums of the centering identity."""

    def kernel(xf_ref, zf_ref, sqxc_ref, sqxr_ref, sqzc_ref, sqzr_ref, out_ref):
        row0 = pl.multiple_of(pl.program_id(0) * bm, bm)

        def panel_dist(f_ref, sqc_ref, sqr_ref):
            # (bm, D) slice of the resident feature matrix; native dtype -> MXU operands.
            panel = f_ref[pl.ds(row0, bm), :]
            gram = lax.dot_general(
                panel, f_ref[...], (((1,), (1,)), ((), ())),
                preferred_element_type=jnp.float32)                       # (bm, n_pad) f32
            # d[i,j] = sqrt(clamp(|xi|^2 + |xj|^2 - 2<xi,xj>, 1e-8))
            d = jnp.sqrt(jnp.maximum(
                sqc_ref[...] - 2.0 * gram + sqr_ref[...], jnp.float32(1e-8)))
            if needs_mask:   # zero padded rows/columns so they drop out of all sums
                cols = lax.broadcasted_iota(jnp.int32, (bm, n_pad), 1)
                rows = lax.broadcasted_iota(jnp.int32, (bm, n_pad), 0) + row0
                d = jnp.where((cols < n_true) & (rows < n_true), d, jnp.float32(0.0))
            return d

        dx = panel_dist(xf_ref, sqxc_ref, sqxr_ref)
        dz = panel_dist(zf_ref, sqzc_ref, sqzr_ref)

        # Panel spans all columns -> these are the full row sums for these rows.
        rx = jnp.sum(dx, axis=1, keepdims=True)   # (bm, 1)
        rz = jnp.sum(dz, axis=1, keepdims=True)

        partials = (
            jnp.sum(dx * dz),   # 0: Σ dx∘dz   (panel)
            jnp.sum(dx * dx),   # 1: Σ dx²
            jnp.sum(dz * dz),   # 2: Σ dz²
            jnp.sum(rx * rz),   # 3: Σ Rx·Rz
            jnp.sum(rx * rx),   # 4: Σ Rx²
            jnp.sum(rz * rz),   # 5: Σ Rz²
            jnp.sum(rx),        # 6: partial Sx
            jnp.sum(rz),        # 7: partial Sz
        )
        # Lane/sublane-dense (8, 128) output block; scalar k lives in row k.
        rid = lax.broadcasted_iota(jnp.int32, (_SUBLANES, _LANES), 0)
        blk = jnp.zeros((_SUBLANES, _LANES), jnp.float32)
        for k, v in enumerate(partials):
            blk = jnp.where(rid == k, v, blk)
        out_ref[0, :, :] = blk

    return kernel


def spherical_distance_correlation(x, z, panel_rows=None):
    """x: (N, Dx), z: (N, Dz) -> scalar float32 distance correlation."""
    n, d_x = x.shape
    nz, d_z = z.shape
    assert n == nz, "x and z must have the same number of samples"

    budget = _vmem_budget_bytes()
    n_pad0 = _round_up(n, _SUBLANES)
    if panel_rows is None:
        bm = _choose_panel_rows(n_pad0, d_x, d_z, x.dtype.itemsize, z.dtype.itemsize, budget)
    else:
        bm = max(_SUBLANES, _round_up(int(panel_rows), _SUBLANES))
        bm = min(bm, n_pad0)
    n_pad = _round_up(n, bm)
    num_blocks = n_pad // bm
    needs_mask = (n_pad != n)

    if needs_mask:
        x_p = jnp.pad(x, ((0, n_pad - n), (0, 0)))
        z_p = jnp.pad(z, ((0, n_pad - n), (0, 0)))
    else:
        x_p, z_p = x, z

    # Squared row norms in f32, computed once; identical values feed both the
    # row and column broadcasts, keeping d bitwise symmetric across panels.
    sqx = jnp.sum(x_p.astype(jnp.float32) ** 2, axis=1, keepdims=True)   # (n_pad, 1)
    sqz = jnp.sum(z_p.astype(jnp.float32) ** 2, axis=1, keepdims=True)
    sqx_row = sqx.reshape(1, n_pad)
    sqz_row = sqz.reshape(1, n_pad)

    est_vmem = (5 * bm * n_pad * 4
                + 2 * n_pad * (d_x * x.dtype.itemsize + d_z * z.dtype.itemsize)
                + 8 * n_pad * 4 + (4 << 20))
    vmem_limit = int(min(budget, max(est_vmem, 32 << 20)))

    cost = pl.CostEstimate(
        flops=int(2 * n_pad * n_pad * (d_x + d_z) + 14 * n_pad * n_pad),
        transcendentals=int(2 * n_pad * n_pad),
        bytes_accessed=int(x.size * x.dtype.itemsize + z.size * z.dtype.itemsize
                           + num_blocks * _SUBLANES * _LANES * 4),
    )

    kernel = _make_partials_kernel(n, n_pad, bm, needs_mask)

    partials = pl.pallas_call(
        kernel,
        out_shape=jax.ShapeDtypeStruct((num_blocks, _SUBLANES, _LANES), jnp.float32),
        grid=(num_blocks,),
        in_specs=[
            pl.BlockSpec((n_pad, d_x), lambda i: (0, 0)),   # x resident across panels
            pl.BlockSpec((n_pad, d_z), lambda i: (0, 0)),   # z resident across panels
            pl.BlockSpec((bm, 1), lambda i: (i, 0)),        # |x_i|^2 column (panel rows)
            pl.BlockSpec((1, n_pad), lambda i: (0, 0)),     # |x_j|^2 row    (all cols)
            pl.BlockSpec((bm, 1), lambda i: (i, 0)),        # |z_i|^2 column
            pl.BlockSpec((1, n_pad), lambda i: (0, 0)),     # |z_j|^2 row
        ],
        out_specs=pl.BlockSpec((1, _SUBLANES, _LANES), lambda i: (i, 0, 0)),
        compiler_params=pltpu.CompilerParams(
            dimension_semantics=("parallel",),
            vmem_limit_bytes=vmem_limit),
        cost_estimate=cost,
    )(x_p, z_p, sqx, sqx_row, sqz, sqz_row)

    # Combine per-panel partial sums (O(num_blocks) scalar work, plain JAX).
    tot = jnp.sum(partials[:, :, 0], axis=0)
    t_dxdz, t_dx2, t_dz2, t_rxrz, t_rx2, t_rz2, s_x, s_z = [tot[k] for k in range(8)]

    inv_n = jnp.float32(1.0 / n)
    inv_n2 = inv_n * inv_n
    inv_n4 = inv_n2 * inv_n2
    # Double-centering identity (d symmetric):
    #   sum(A∘B) = Σ dx∘dz − (2/N)·Σ_i Rx_i·Rz_i + Sx·Sz / N²
    sAB = t_dxdz - 2.0 * inv_n * t_rxrz + s_x * s_z * inv_n2
    sAA = t_dx2 - 2.0 * inv_n * t_rx2 + s_x * s_x * inv_n2
    sBB = t_dz2 - 2.0 * inv_n * t_rz2 + s_z * s_z * inv_n2

    # mean(A*B)/n^2 == sum(A*B)/n^4 ; clamp on dCov mirrors PyTorch. sAA/sBB are
    # mathematically >= 0, so the clamp only guards tiny negative f32 cancellation
    # (degenerate constant inputs still give NaN from 0/0, as in PyTorch).
    dCovXY = jnp.sqrt(jnp.maximum(sAB * inv_n4, 0.0))
    dVarXX = jnp.sqrt(jnp.maximum(sAA, 0.0) * inv_n4)
    dVarYY = jnp.sqrt(jnp.maximum(sBB, 0.0) * inv_n4)
    return dCovXY / jnp.sqrt(dVarXX * dVarYY)


def _reference(x, z):
    """Plain-JAX reference mirroring the PyTorch forward exactly."""
    x = x.astype(jnp.float32)
    z = z.astype(jnp.float32)
    n = x.shape[0]

    def pd(a):
        r = jnp.sum(a * a, axis=1, keepdims=True)
        d = r - 2.0 * (a @ a.T) + r.T
        return jnp.sqrt(jnp.maximum(d, 1e-8))

    a, b = pd(x), pd(z)

    def center(m):
        return m - jnp.mean(m, axis=1)[None, :] - jnp.mean(m, axis=0)[:, None] + jnp.mean(m)

    A, B = center(a), center(b)
    n2 = float(n * n)
    dCov = jnp.sqrt(jnp.maximum(jnp.mean(A * B) / n2, 0.0))
    dVx = jnp.sqrt(jnp.mean(A * A) / n2)
    dVy = jnp.sqrt(jnp.mean(B * B) / n2)
    return dCov / jnp.sqrt(dVx * dVy)


if __name__ == "__main__":
    key = jax.random.PRNGKey(0)
    k1, k2, k3, k4 = jax.random.split(key, 4)

    # Small shapes consistent with the module: x (batch, feat_x), z (batch, feat_z).
    N, DX, DZ = 8, 32, 16
    x = jax.random.normal(k1, (N, DX), dtype=jnp.float32)
    z = jax.random.normal(k2, (N, DZ), dtype=jnp.float32)
    out = jax.block_until_ready(spherical_distance_correlation(x, z))
    ref = jax.block_until_ready(_reference(x, z))
    assert jnp.allclose(out, ref, rtol=2e-3, atol=2e-4), (out, ref)

    # Ragged N + multi-panel grid path (padding/masking + "parallel" axis), correlated data.
    N2, DX2, DZ2 = 160, 24, 12
    x2 = jax.random.normal(k3, (N2, DX2), dtype=jnp.float32)
    z2 = 0.8 * x2[:, :DZ2] + 0.6 * jax.random.normal(k4, (N2, DZ2), dtype=jnp.float32)
    out2 = jax.block_until_ready(spherical_distance_correlation(x2, z2, panel_rows=64))
    ref2 = jax.block_until_ready(_reference(x2, z2))
    assert jnp.allclose(out2, ref2, rtol=2e-3, atol=2e-4), (out2, ref2)

    # bf16 path: native-dtype MXU operands; sanity-check finiteness.
    out_bf16 = jax.block_until_ready(
        spherical_distance_correlation(x.astype(jnp.bfloat16), z.astype(jnp.bfloat16)))
    assert bool(jnp.isfinite(out_bf16)), out_bf16

    print("KERNEL_OK")
</pallas_src>

<mosaic_0001>
module attributes {stable_mosaic.version = 11 : i64} {
  func.func @kernel(%arg0: i32, %arg1: memref<8x32xf32, #tpu.memory_space<vmem>>, %arg2: memref<8x16xf32, #tpu.memory_space<vmem>>, %arg3: memref<8x1xf32, #tpu.memory_space<vmem>>, %arg4: memref<1x8xf32, #tpu.memory_space<vmem>>, %arg5: memref<8x1xf32, #tpu.memory_space<vmem>>, %arg6: memref<1x8xf32, #tpu.memory_space<vmem>>, %arg7: memref<1x8x128xf32, #tpu.memory_space<vmem>>) attributes {dimension_semantics = [#tpu.dimension_semantics<parallel>], iteration_bounds = array<i64: 1>, scalar_prefetch = 0 : i64, scratch_operands = 0 : i64, tpu.core_type = #tpu.core_type<tc>, window_params = [{pipeline_mode = #tpu.pipeline_mode<synchronous>, transform_indices = @transform_0, window_bounds = array<i64: 8, 32>}, {pipeline_mode = #tpu.pipeline_mode<synchronous>, transform_indices = @transform_1, window_bounds = array<i64: 8, 16>}, {transform_indices = @transform_2, window_bounds = array<i64: 8, 1>}, {pipeline_mode = #tpu.pipeline_mode<synchronous>, transform_indices = @transform_3, window_bounds = array<i64: 1, 8>}, {transform_indices = @transform_4, window_bounds = array<i64: 8, 1>}, {pipeline_mode = #tpu.pipeline_mode<synchronous>, transform_indices = @transform_5, window_bounds = array<i64: 1, 8>}, {transform_indices = @transform_6, window_bounds = array<i64: 1, 8, 128>}]} {
    %c8_i32 = arith.constant 8 : i32
    %0 = arith.muli %arg0, %c8_i32 : i32
    %1 = tpu.assume_multiple %0, 8 : i32
    %2 = arith.index_cast %1 : i32 to index
    %c0 = arith.constant 0 : index
    %3 = vector.load %arg1[%2, %c0] : memref<8x32xf32, #tpu.memory_space<vmem>>, vector<8x32xf32>
    %c0_0 = arith.constant 0 : index
    %c0_1 = arith.constant 0 : index
    %4 = vector.load %arg1[%c0_0, %c0_1] : memref<8x32xf32, #tpu.memory_space<vmem>>, vector<8x32xf32>
    %cst = arith.constant dense<0.000000e+00> : vector<8x8xf32>
    %5 = tpu.matmul %3, %4, %cst {dimension_numbers = #tpu.dot_dimension_numbers<[1], [1], [0], [0], [0, 0, 1, 0], [], []>} : vector<8x32xf32>, vector<8x32xf32>, vector<8x8xf32> -> vector<8x8xf32>
    %c0_2 = arith.constant 0 : index
    %c0_3 = arith.constant 0 : index
    %6 = vector.load %arg3[%c0_2, %c0_3] : memref<8x1xf32, #tpu.memory_space<vmem>>, vector<8x1xf32>
    %cst_4 = arith.constant 2.000000e+00 : f32
    %7 = vector.broadcast %cst_4 : f32 to vector<8x8xf32>
    %8 = arith.mulf %7, %5 : vector<8x8xf32>
    %9 = vector.broadcast %6 : vector<8x1xf32> to vector<8x8xf32>
    %10 = arith.subf %9, %8 : vector<8x8xf32>
    %c0_5 = arith.constant 0 : index
    %c0_6 = arith.constant 0 : index
    %11 = vector.load %arg4[%c0_5, %c0_6] : memref<1x8xf32, #tpu.memory_space<vmem>>, vector<1x8xf32>
    %12 = vector.broadcast %11 : vector<1x8xf32> to vector<8x8xf32>
    %13 = arith.addf %10, %12 : vector<8x8xf32>
    %cst_7 = arith.constant 9.99999993E-9 : f32
    %14 = vector.broadcast %cst_7 : f32 to vector<8x8xf32>
    %15 = arith.maximumf %13, %14 : vector<8x8xf32>
    %16 = math.sqrt %15 : vector<8x8xf32>
    %17 = arith.index_cast %1 : i32 to index
    %c0_8 = arith.constant 0 : index
    %18 = vector.load %arg2[%17, %c0_8] : memref<8x16xf32, #tpu.memory_space<vmem>>, vector<8x16xf32>
    %c0_9 = arith.constant 0 : index
    %c0_10 = arith.constant 0 : index
    %19 = vector.load %arg2[%c0_9, %c0_10] : memref<8x16xf32, #tpu.memory_space<vmem>>, vector<8x16xf32>
    %cst_11 = arith.constant dense<0.000000e+00> : vector<8x8xf32>
    %20 = tpu.matmul %18, %19, %cst_11 {dimension_numbers = #tpu.dot_dimension_numbers<[1], [1], [0], [0], [0, 0, 1, 0], [], []>} : vector<8x16xf32>, vector<8x16xf32>, vector<8x8xf32> -> vector<8x8xf32>
    %c0_12 = arith.constant 0 : index
    %c0_13 = arith.constant 0 : index
    %21 = vector.load %arg5[%c0_12, %c0_13] : memref<8x1xf32, #tpu.memory_space<vmem>>, vector<8x1xf32>
    %cst_14 = arith.constant 2.000000e+00 : f32
    %22 = vector.broadcast %cst_14 : f32 to vector<8x8xf32>
    %23 = arith.mulf %22, %20 : vector<8x8xf32>
    %24 = vector.broadcast %21 : vector<8x1xf32> to vector<8x8xf32>
    %25 = arith.subf %24, %23 : vector<8x8xf32>
    %c0_15 = arith.constant 0 : index
    %c0_16 = arith.constant 0 : index
    %26 = vector.load %arg6[%c0_15, %c0_16] : memref<1x8xf32, #tpu.memory_space<vmem>>, vector<1x8xf32>
    %27 = vector.broadcast %26 : vector<1x8xf32> to vector<8x8xf32>
    %28 = arith.addf %25, %27 : vector<8x8xf32>
    %cst_17 = arith.constant 9.99999993E-9 : f32
    %29 = vector.broadcast %cst_17 : f32 to vector<8x8xf32>
    %30 = arith.maximumf %28, %29 : vector<8x8xf32>
    %31 = math.sqrt %30 : vector<8x8xf32>
    %cst_18 = arith.constant dense<0.000000e+00> : vector<8xf32>
    %32 = vector.multi_reduction <add>, %16, %cst_18 [1] : vector<8x8xf32> to vector<8xf32>
    %33 = vector.shape_cast %32 : vector<8xf32> to vector<8x1xf32>
    %cst_19 = arith.constant dense<0.000000e+00> : vector<8xf32>
    %34 = vector.multi_reduction <add>, %31, %cst_19 [1] : vector<8x8xf32> to vector<8xf32>
    %35 = vector.shape_cast %34 : vector<8xf32> to vector<8x1xf32>
    %36 = arith.mulf %16, %31 : vector<8x8xf32>
    %37 = vector.shape_cast %36 : vector<8x8xf32> to vector<1x8x8xf32>
    %cst_20 = arith.constant dense<0.000000e+00> : vector<1xf32>
    %38 = vector.multi_reduction <add>, %37, %cst_20 [1, 2] : vector<1x8x8xf32> to vector<1xf32>
    %39 = vector.shape_cast %38 : vector<1xf32> to vector<1x1x1xf32>
    %40 = vector.extract %39[0, 0, 0] : f32 from vector<1x1x1xf32>
    %41 = arith.mulf %16, %16 : vector<8x8xf32>
    %42 = vector.shape_cast %41 : vector<8x8xf32> to vector<1x8x8xf32>
    %cst_21 = arith.constant dense<0.000000e+00> : vector<1xf32>
    %43 = vector.multi_reduction <add>, %42, %cst_21 [1, 2] : vector<1x8x8xf32> to vector<1xf32>
    %44 = vector.shape_cast %43 : vector<1xf32> to vector<1x1x1xf32>
    %45 = vector.extract %44[0, 0, 0] : f32 from vector<1x1x1xf32>
    %46 = arith.mulf %31, %31 : vector<8x8xf32>
    %47 = vector.shape_cast %46 : vector<8x8xf32> to vector<1x8x8xf32>
    %cst_22 = arith.constant dense<0.000000e+00> : vector<1xf32>
    %48 = vector.multi_reduction <add>, %47, %cst_22 [1, 2] : vector<1x8x8xf32> to vector<1xf32>
    %49 = vector.shape_cast %48 : vector<1xf32> to vector<1x1x1xf32>
    %50 = vector.extract %49[0, 0, 0] : f32 from vector<1x1x1xf32>
    %51 = arith.mulf %33, %35 : vector<8x1xf32>
    %52 = vector.shape_cast %51 : vector<8x1xf32> to vector<1x8x1xf32>
    %cst_23 = arith.constant dense<0.000000e+00> : vector<1xf32>
    %53 = vector.multi_reduction <add>, %52, %cst_23 [1, 2] : vector<1x8x1xf32> to vector<1xf32>
    %54 = vector.shape_cast %53 : vector<1xf32> to vector<1x1x1xf32>
    %55 = vector.extract %54[0, 0, 0] : f32 from vector<1x1x1xf32>
    %56 = arith.mulf %33, %33 : vector<8x1xf32>
    %57 = vector.shape_cast %56 : vector<8x1xf32> to vector<1x8x1xf32>
    %cst_24 = arith.constant dense<0.000000e+00> : vector<1xf32>
    %58 = vector.multi_reduction <add>, %57, %cst_24 [1, 2] : vector<1x8x1xf32> to vector<1xf32>
    %59 = vector.shape_cast %58 : vector<1xf32> to vector<1x1x1xf32>
    %60 = vector.extract %59[0, 0, 0] : f32 from vector<1x1x1xf32>
    %61 = arith.mulf %35, %35 : vector<8x1xf32>
    %62 = vector.shape_cast %61 : vector<8x1xf32> to vector<1x8x1xf32>
    %cst_25 = arith.constant dense<0.000000e+00> : vector<1xf32>
    %63 = vector.multi_reduction <add>, %62, %cst_25 [1, 2] : vector<1x8x1xf32> to vector<1xf32>
    %64 = vector.shape_cast %63 : vector<1xf32> to vector<1x1x1xf32>
    %65 = vector.extract %64[0, 0, 0] : f32 from vector<1x1x1xf32>
    %66 = vector.shape_cast %33 : vector<8x1xf32> to vector<1x8x1xf32>
    %cst_26 = arith.constant dense<0.000000e+00> : vector<1xf32>
    %67 = vector.multi_reduction <add>, %66, %cst_26 [1, 2] : vector<1x8x1xf32> to vector<1xf32>
    %68 = vector.shape_cast %67 : vector<1xf32> to vector<1x1x1xf32>
    %69 = vector.extract %68[0, 0, 0] : f32 from vector<1x1x1xf32>
    %70 = vector.shape_cast %35 : vector<8x1xf32> to vector<1x8x1xf32>
    %cst_27 = arith.constant dense<0.000000e+00> : vector<1xf32>
    %71 = vector.multi_reduction <add>, %70, %cst_27 [1, 2] : vector<1x8x1xf32> to vector<1xf32>
    %72 = vector.shape_cast %71 : vector<1xf32> to vector<1x1x1xf32>
    %73 = vector.extract %72[0, 0, 0] : f32 from vector<1x1x1xf32>
    %74 = tpu.iota {dimensions = array<i32: 0>} : vector<8x128xi32>
    %cst_28 = arith.constant 0.000000e+00 : f32
    %75 = vector.broadcast %cst_28 : f32 to vector<8x128xf32>
    %c0_i32 = arith.constant 0 : i32
    %76 = vector.broadcast %c0_i32 : i32 to vector<8x128xi32>
    %77 = arith.cmpi eq, %74, %76 : vector<8x128xi32>
    %78 = vector.broadcast %40 : f32 to vector<8x128xf32>
    %79 = arith.select %77, %78, %75 : vector<8x128xi1>, vector<8x128xf32>
    %c1_i32 = arith.constant 1 : i32
    %80 = vector.broadcast %c1_i32 : i32 to vector<8x128xi32>
    %81 = arith.cmpi eq, %74, %80 : vector<8x128xi32>
    %82 = vector.broadcast %45 : f32 to vector<8x128xf32>
    %83 = arith.select %81, %82, %79 : vector<8x128xi1>, vector<8x128xf32>
    %c2_i32 = arith.constant 2 : i32
    %84 = vector.broadcast %c2_i32 : i32 to vector<8x128xi32>
    %85 = arith.cmpi eq, %74, %84 : vector<8x128xi32>
    %86 = vector.broadcast %50 : f32 to vector<8x128xf32>
    %87 = arith.select %85, %86, %83 : vector<8x128xi1>, vector<8x128xf32>
    %c3_i32 = arith.constant 3 : i32
    %88 = vector.broadcast %c3_i32 : i32 to vector<8x128xi32>
    %89 = arith.cmpi eq, %74, %88 : vector<8x128xi32>
    %90 = vector.broadcast %55 : f32 to vector<8x128xf32>
    %91 = arith.select %89, %90, %87 : vector<8x128xi1>, vector<8x128xf32>
    %c4_i32 = arith.constant 4 : i32
    %92 = vector.broadcast %c4_i32 : i32 to vector<8x128xi32>
    %93 = arith.cmpi eq, %74, %92 : vector<8x128xi32>
    %94 = vector.broadcast %60 : f32 to vector<8x128xf32>
    %95 = arith.select %93, %94, %91 : vector<8x128xi1>, vector<8x128xf32>
    %c5_i32 = arith.constant 5 : i32
    %96 = vector.broadcast %c5_i32 : i32 to vector<8x128xi32>
    %97 = arith.cmpi eq, %74, %96 : vector<8x128xi32>
    %98 = vector.broadcast %65 : f32 to vector<8x128xf32>
    %99 = arith.select %97, %98, %95 : vector<8x128xi1>, vector<8x128xf32>
    %c6_i32 = arith.constant 6 : i32
    %100 = vector.broadcast %c6_i32 : i32 to vector<8x128xi32>
    %101 = arith.cmpi eq, %74, %100 : vector<8x128xi32>
    %102 = vector.broadcast %69 : f32 to vector<8x128xf32>
    %103 = arith.select %101, %102, %99 : vector<8x128xi1>, vector<8x128xf32>
    %c7_i32 = arith.constant 7 : i32
    %104 = vector.broadcast %c7_i32 : i32 to vector<8x128xi32>
    %105 = arith.cmpi eq, %74, %104 : vector<8x128xi32>
    %106 = vector.broadcast %73 : f32 to vector<8x128xf32>
    %107 = arith.select %105, %106, %103 : vector<8x128xi1>, vector<8x128xf32>
    %c0_29 = arith.constant 0 : index
    %c0_30 = arith.constant 0 : index
    %c0_31 = arith.constant 0 : index
    %108 = vector.load %arg7[%c0_29, %c0_30, %c0_31] : memref<1x8x128xf32, #tpu.memory_space<vmem>>, vector<1x8x128xf32>
    %109 = vector.shape_cast %108 : vector<1x8x128xf32> to vector<8x128xf32>
    %110 = vector.shape_cast %107 : vector<8x128xf32> to vector<1x8x128xf32>
    tpu.vector_store %arg7[%c0_29, %c0_30, %c0_31], %110 {strides = array<i32>} : memref<1x8x128xf32, #tpu.memory_space<vmem>>, vector<1x8x128xf32>,
    return
  }
  func.func @transform_0(%arg0: i32) -> (i32, i32) {
    %c0_i32 = arith.constant 0 : i32
    %c0_i32_0 = arith.constant 0 : i32
    %c0_i32_1 = arith.constant 0 : i32
    return %c0_i32, %c0_i32_0 : i32, i32
  }
  func.func @transform_1(%arg0: i32) -> (i32, i32) {
    %c0_i32 = arith.constant 0 : i32
    %c0_i32_0 = arith.constant 0 : i32
    %c0_i32_1 = arith.constant 0 : i32
    return %c0_i32, %c0_i32_0 : i32, i32
  }
  func.func @transform_2(%arg0: i32) -> (i32, i32) {
    %c0_i32 = arith.constant 0 : i32
    %c0_i32_0 = arith.constant 0 : i32
    return %arg0, %c0_i32 : i32, i32
  }
  func.func @transform_3(%arg0: i32) -> (i32, i32) {
    %c0_i32 = arith.constant 0 : i32
    %c0_i32_0 = arith.constant 0 : i32
    %c0_i32_1 = arith.constant 0 : i32
    return %c0_i32, %c0_i32_0 : i32, i32
  }
  func.func @transform_4(%arg0: i32) -> (i32, i32) {
    %c0_i32 = arith.constant 0 : i32
    %c0_i32_0 = arith.constant 0 : i32
    return %arg0, %c0_i32 : i32, i32
  }
  func.func @transform_5(%arg0: i32) -> (i32, i32) {
    %c0_i32 = arith.constant 0 : i32
    %c0_i32_0 = arith.constant 0 : i32
    %c0_i32_1 = arith.constant 0 : i32
    return %c0_i32, %c0_i32_0 : i32, i32
  }
  func.func @transform_6(%arg0: i32) -> (i32, i32, i32) {
    %c0_i32 = arith.constant 0 : i32
    %c0_i32_0 = arith.constant 0 : i32
    %c0_i32_1 = arith.constant 0 : i32
    return %arg0, %c0_i32, %c0_i32_0 : i32, i32, i32
  }
}

</mosaic_0001>

<bundles_post_ra>
// kernel: tpu_custom_call.1
= control target key start
LH: loop header
LB: loop body
LE: loop exit
PB: predicated region body
PF: predicated region fallthrough
CT: control target
= control target key end

     0   :  { %vm28_vm0 = vcmask 261120   ;;  %vm132_vm1 = vcmask 130048   ;;  %v437_v2 = vmov 0.0   ;;  %s516_s0 = inlined_call_operand.vmem [shape: f32[8,32], index: 0, kind: input, shape index: {}]   ;;  %s517_s1 = inlined_call_operand.vmem [shape: f32[8,16], index: 1, kind: input, shape index: {}]   ;;  %s518_s2 = inlined_call_operand.vmem [shape: f32[8,1], index: 2, kind: input, shape index: {}]   ;;  %s519_s3 = inlined_call_operand.vmem [shape: f32[1,8], index: 3, kind: input, shape index: {}]   ;;  %s520_s4 = inlined_call_operand.vmem [shape: f32[8,1], index: 4, kind: input, shape index: {}]   ;;  %s521_s5 = inlined_call_operand.vmem [shape: f32[1,8], index: 5, kind: input, shape index: {}]   ;;  %s522_s6 = inlined_call_operand.hbm [shape: f32[1,8,128], index: 6, kind: output, shape index: {}]  }
   0x1   :  { %v27_v0 = vld [vmem:[%s516_s0] sm:$0xff]  ;;  %378 = vmatprep.subr.mxu0 %v437_v2  ;;  %383 = vmatprep.subr.mxu1 %v437_v2 }
   0x2   :  { %v131_v1 = vld [vmem:[%s517_s1] sm:$0xff] }
   0x3   :  { %11 = vsyncpa [#allocation3], 0  ;;  %379 = vmatpush3.xpose.msk.msra.mxu0 %vm28_vm0, %v27_v0  ;;  %384 = vmatpush3.xpose.msk.msra.mxu1 %vm132_vm1, %v131_v1  ;;  %vm438_vm2 = vmmov 0   ;;  %v105_v3 = vld [vmem:[%s518_s2] sm:$0xff]  ;;  %v439_v4 = vmov 0   ;;  %vm233_vm3 = vcmask 64512  }
   0x4   :  { %380 = vmatprep.mubr.msk.f32.mxu0 %vm438_vm2, %v437_v2  ;;  %385 = vmatprep.mubr.msk.f32.mxu1 %vm438_vm2, %v437_v2  ;;  %v209_v5 = vld [vmem:[%s520_s4] sm:$0xff]  ;;  %vm274_vm8 = vcmask 7168   ;;  %s440_s10 = smov [#allocation2]  }
   0x5   :  { %408 = vset.pattern.permute.xlu0 %v439_v4  ;;  %v370_v14 = vld [vmem:[%s519_s3] ss:$0 sm:$0xff]  ;;  %s360_s11 = sshll.u32 %s440_s10, 4  ;;  %s361_s11 = int_to_ptr.vmem [resolvable:$true] %s360_s11 }
   0x6   :  { %381 = vmatmul.mubr.msk.f32.vlgmr.msra.gmra.mrb[0].mxu0 %vm28_vm0, %v27_v0  ;;  %386 = vmatmul.mubr.msk.f32.vlgmr.msra.gmra.mrb[0].mxu1 %vm132_vm1, %v131_v1  ;;  %v373_v15 = vld [vmem:[%s521_s5] ss:$0 sm:$0xff]  ;;  %s413_s13 = scalar_lea.vmem %s361_s11, 128  ;;  %p418_p1 = scmp.lt.s32.totalorder %s361_s11, %s361_s11 }
   0x7   :  { %109 = vperm.xlu0 %408, %v105_v3   ;;  %p414_p0 = scmp.ne.s32.totalorder %s361_s11, %s413_s13  ;;  %p419_p2 = scmp.lt.s32.totalorder %s413_s13, %s413_s13 }
   0x9   :  { %p420_p3 = por %p419_p2, %p418_p1 }
   0xb   :  { %213 = vperm.xlu0 %408, %v209_v5   ;;  %p421_p4 = pnand %p420_p3, %p414_p0 }
  0x86   :  { %v110_v6 = vpop.permute.xlu0 %109 }
  0x8a   :  { %v214_v7 = vpop.permute.xlu0 %213 }
  0xd9   :  { %v101_v8 = vpop.f32.mrb[0].mxu0  ;;  %v205_v9 = vpop.f32.mrb[0].mxu1 }
  0xda   :  { %v106_v10 = vmul.f32 2.0, %v101_v8  ;;  %v210_v11 = vmul.f32 2.0, %v205_v9  ;;  %v382_v12 = vpop.f32.mrb[1].mxu0  ;;  %v387_v13 = vpop.f32.mrb[1].mxu1 }
  0xdc   :  { %v112_v16 = vsub.f32 %v110_v6, %v106_v10  ;;  %v216_v17 = vsub.f32 %v214_v7, %v210_v11 }
  0xde   :  { %v120_v18 = vadd.f32 %v370_v14, %v112_v16  ;;  %v224_v19 = vadd.f32 %v373_v15, %v216_v17 }
  0xe0   :  { %v121_v20 = vmax.f32 %v120_v18, 1e-08  ;;  %v225_v21 = vmax.f32 %v224_v19, 1e-08 }
  0xe2   :  { %409 = vrsqrt.f32 %v225_v21  ;;  %vm228_vm4 = vcmp.eq.f32.partialorder %v225_v21, inf  ;;  %v231_v26 = vand.u32 2147483648, %v225_v21  ;;  %vm124_vm5 = vcmp.eq.f32.partialorder %v121_v20, inf }
  0xe3   :  { %411 = vrsqrt.f32 %v121_v20  ;;  %v127_v27 = vand.u32 2147483648, %v121_v20  ;;  %vm230_vm6 = vcmp.eq.f32.partialorder %v225_v21, 0.0  ;;  %vm126_vm7 = vcmp.eq.f32.partialorder %v121_v20, 0.0 }
  0xec   :  { %v410_v22 = vpop.eup %409 }
  0xed   :  { %v412_v23 = vpop.eup %411  ;;  %v227_v24 = vmul.f32 %v410_v22, %v225_v21 }
  0xee   :  { %v123_v25 = vmul.f32 %v412_v23, %v121_v20 }
  0xef   :  { %v229_v28 = vsel %vm228_vm4, %v225_v21, %v227_v24 }
  0xf0   :  { %v125_v29 = vsel %vm124_vm5, %v121_v20, %v123_v25  ;;  %v232_v30 = vsel %vm230_vm6, %v231_v26, %v229_v28 }
  0xf1   :  { %v128_v31 = vsel %vm126_vm7, %v127_v27, %v125_v29  ;;  %v237_v35 = vsel %vm233_vm3, %v232_v30, 0.0  ;;  %v262_v38 = vmul.f32 %v232_v30, %v232_v30 }
  0xf2   :  { %v234_v32 = vsel %vm233_vm3, %v128_v31, 0.0  ;;  %v240_v33 = vmul.f32 %v232_v30, %v128_v31  ;;  %v251_v36 = vmul.f32 %v128_v31, %v128_v31 }
  0xf3   :  { %235 = vadd.xlane.f32.xlu1 %v234_v32  ;;  %v263_v39 = vsel %vm233_vm3, %v262_v38, 0.0 }
  0xf4   :  { %v241_v34 = vsel %vm233_vm3, %v240_v33, 0.0  ;;  %v252_v37 = vsel %vm233_vm3, %v251_v36, 0.0 }
  0xf5   :  { %242 = vadd.xlane.f32.xlu0 %v241_v34 }
  0xf7   :  { %238 = vadd.xlane.f32.xlu1 %v237_v35 }
  0xfb   :  { %253 = vadd.xlane.f32.xlu1 %v252_v37 }
  0xff   :  { %264 = vadd.xlane.f32.xlu1 %v263_v39 }
 0x180   :  { %v236_v40 = vpop.xlane.xlu1 %235 }
 0x181   :  { %v307_v41 = vsel %vm274_vm8, %v236_v40, 0.0  ;;  %v285_v49 = vmul.f32 %v236_v40, %v236_v40 }
 0x182   :  { %v243_v42 = vpop.xlane.xlu0 %242  ;;  %308 = vadd.xlane.f32.xlu1 %v307_v41 }
 0x183   :  { %v244_v43 = vrot.slane %v243_v42, 4  ;;  %v286_v54 = vsel %vm274_vm8, %v285_v49, 0.0 }
 0x184   :  { %v239_v44 = vpop.xlane.xlu1 %238 }
 0x185   :  { %v245_v45 = vadd.f32 %v244_v43, %v243_v42  ;;  %v273_v46 = vmul.f32 %v239_v44, %v236_v40  ;;  %v296_v56 = vmul.f32 %v239_v44, %v239_v44  ;;  %v317_v2 = vsel %vm274_vm8, %v239_v44, 0.0 }
 0x186   :  { %v327_v42 = vlaneseq }
 0x187   :  { %v246_v47 = vrot.slane %v245_v45, 2  ;;  %v275_v48 = vsel %vm274_vm8, %v273_v46, 0.0  ;;  %v297_v62 = vsel %vm274_vm8, %v296_v56, 0.0 }
 0x188   :  { %276 = vadd.xlane.f32.xlu1 %v275_v48  ;;  %v254_v50 = vpop.xlane.xlu1 %253  ;;  %v328_v43 = vshrl.u32 %v327_v42, 7 }
 0x189   :  { %v255_v51 = vrot.slane %v254_v50, 4  ;;  %v247_v52 = vadd.f32 %v246_v47, %v245_v45 }
 0x18a   :  { %vm329_vm9 = vcmp.eq.s32.totalorder %v328_v43, 0  ;;  %vm332_vm10 = vcmp.eq.s32.totalorder %v328_v43, 1  ;;  %vm335_vm11 = vcmp.eq.s32.totalorder %v328_v43, 2  ;;  %vm338_vm12 = vcmp.eq.s32.totalorder %v328_v43, 3 }
 0x18b   :  { %v256_v53 = vadd.f32 %v255_v51, %v254_v50  ;;  %v248_v55 = vrot.slane %v247_v52, 1  ;;  %vm341_vm13 = vcmp.eq.s32.totalorder %v328_v43, 4  ;;  %vm344_vm14 = vcmp.eq.s32.totalorder %v328_v43, 5 }
 0x18c   :  { %287 = vadd.xlane.f32.xlu1 %v286_v54  ;;  %v265_v57 = vpop.xlane.xlu1 %264  ;;  %vm347_vm15 = vcmp.eq.s32.totalorder %v328_v43, 6  ;;  %vm350_vm0 = vcmp.eq.s32.totalorder %v328_v43, 7 }
 0x18d   :  { %v257_v58 = vrot.slane %v256_v53, 2  ;;  %v266_v59 = vrot.slane %v265_v57, 4  ;;  %v249_v60 = vadd.f32 %v248_v55, %v247_v52 }
 0x18f   :  { %v267_v61 = vadd.f32 %v266_v59, %v265_v57  ;;  %388 = vpush %v249_v60  ;;  %v258_v63 = vadd.f32 %v257_v58, %v256_v53 }
 0x190   :  { %298 = vadd.xlane.f32.xlu1 %v297_v62 }
 0x191   :  { %v268_v0 = vrot.slane %v267_v61, 2  ;;  %v259_v1 = vrot.slane %v258_v63, 1 }
 0x193   :  { %v260_v3 = vadd.f32 %v259_v1, %v258_v63  ;;  %v269_v4 = vadd.f32 %v268_v0, %v267_v61 }
 0x194   :  { %318 = vadd.xlane.f32.xlu1 %v317_v2 }
 0x195   :  { %390 = vpush %v260_v3  ;;  %v270_v5 = vrot.slane %v269_v4, 1 }
 0x197   :  { %v271_v6 = vadd.f32 %v270_v5, %v269_v4 }
 0x199   :  { %392 = vpush %v271_v6 }
 0x1c0   :  { %s389_s3 = spop %388 }
 0x1c1   :  { %v330_v44 = vstv %s389_s3 }
 0x1c2   :  { %v331_v47 = vsel %vm329_vm9, %v330_v44, 0.0 }
 0x1c6   :  { %s391_s4 = spop %390 }
 0x1c7   :  { %v333_v45 = vstv %s391_s4 }
 0x1c8   :  { %v334_v49 = vsel %vm332_vm10, %v333_v45, %v331_v47 }
 0x1ca   :  { %s393_s5 = spop %392 }
 0x1cb   :  { %v336_v46 = vstv %s393_s5 }
 0x1cc   :  { %v337_v51 = vsel %vm335_vm11, %v336_v46, %v334_v49 }
 0x20f   :  { %v309_v7 = vpop.xlane.xlu1 %308 }
 0x210   :  { %v310_v8 = vrot.slane %v309_v7, 4 }
 0x212   :  { %v311_v12 = vadd.f32 %v310_v8, %v309_v7 }
 0x214   :  { %v312_v18 = vrot.slane %v311_v12, 2 }
 0x215   :  { %v277_v9 = vpop.xlane.xlu1 %276 }
 0x216   :  { %v278_v10 = vrot.slane %v277_v9, 4  ;;  %v313_v27 = vadd.f32 %v312_v18, %v311_v12 }
 0x218   :  { %v279_v11 = vadd.f32 %v278_v10, %v277_v9  ;;  %v314_v34 = vrot.slane %v313_v27, 1 }
 0x219   :  { %v288_v13 = vpop.xlane.xlu1 %287 }
 0x21a   :  { %v280_v14 = vrot.slane %v279_v11, 2  ;;  %v289_v15 = vrot.slane %v288_v13, 4  ;;  %v315_v39 = vadd.f32 %v314_v34, %v313_v27 }
 0x21c   :  { %v290_v16 = vadd.f32 %v289_v15, %v288_v13  ;;  %v281_v17 = vadd.f32 %v280_v14, %v279_v11 }
 0x21d   :  { %v299_v19 = vpop.xlane.xlu1 %298 }
 0x21e   :  { %v291_v20 = vrot.slane %v290_v16, 2  ;;  %v300_v21 = vrot.slane %v299_v19, 4  ;;  %v282_v22 = vrot.slane %v281_v17, 1 }
 0x220   :  { %v301_v23 = vadd.f32 %v300_v21, %v299_v19  ;;  %v283_v24 = vadd.f32 %v282_v22, %v281_v17  ;;  %v292_v25 = vadd.f32 %v291_v20, %v290_v16 }
 0x221   :  { %v319_v26 = vpop.xlane.xlu1 %318 }
 0x222   :  { %v302_v28 = vrot.slane %v301_v23, 2  ;;  %v320_v29 = vrot.slane %v319_v26, 4  ;;  %394 = vpush %v283_v24  ;;  %v293_v30 = vrot.slane %v292_v25, 1 }
 0x224   :  { %v321_v31 = vadd.f32 %v320_v29, %v319_v26  ;;  %v294_v32 = vadd.f32 %v293_v30, %v292_v25  ;;  %v303_v33 = vadd.f32 %v302_v28, %v301_v23 }
 0x226   :  { %v322_v35 = vrot.slane %v321_v31, 2  ;;  %396 = vpush %v294_v32  ;;  %v304_v36 = vrot.slane %v303_v33, 1 }
 0x228   :  { %v323_v37 = vadd.f32 %v322_v35, %v321_v31  ;;  %v305_v38 = vadd.f32 %v304_v36, %v303_v33 }
 0x22a   :  { %398 = vpush %v305_v38  ;;  %v324_v40 = vrot.slane %v323_v37, 1 }
 0x22b   :  { %400 = vpush %v315_v39 }
 0x22c   :  { %v325_v41 = vadd.f32 %v324_v40, %v323_v37 }
 0x22e   :  { %402 = vpush %v325_v41 }
 0x253   :  { %s395_s30 = spop %394 }
 0x254   :  { %v339_v48 = vstv %s395_s30 }
 0x255   :  { %v340_v52 = vsel %vm338_vm12, %v339_v48, %v337_v51 }
 0x257   :  { %s397_s7 = spop %396 }
 0x258   :  { %v342_v50 = vstv %s397_s7 }
 0x259   :  { %v343_v53 = vsel %vm341_vm13, %v342_v50, %v340_v52 }
 0x25b   :  { %s399_s8 = spop %398 }
 0x25c   :  { %v345_v54 = vstv %s399_s8  ;;  %s401_s9 = spop %400 }
 0x25d   :  { %v346_v55 = vsel %vm344_vm14, %v345_v54, %v343_v53  ;;  %v348_v56 = vstv %s401_s9 }
 0x25e   :  { %v349_v57 = vsel %vm347_vm15, %v348_v56, %v346_v55 }
 0x25f   :  { %s403_s12 = spop %402 }
 0x260   :  { %v351_v58 = vstv %s403_s12 }
 0x261   :  { %v352_v59 = vsel %vm350_vm0, %v351_v58, %v349_v57 }
 0x262   :  { %353 = vst [vmem:[#allocation2] sm:$0xff] %v352_v59 }
 0x263   :  { %424 = shalt.err (!%p421_p4)
}
 0x264   :  { %s425_s16 = scalar_lea.hbm %s522_s6, 128 }
 0x265   :  { %p426_p5 = scmp.ne.s32.totalorder %s522_s6, %s425_s16  ;;  %p429_p6 = scmp.lt.u32.totalorder %s425_s16, %s522_s6 }
 0x267   :  { %p431_p7 = pnand %p429_p6, %p426_p5 }
 0x269   :  { %434 = shalt.err (!%p431_p7)
}
 0x26a   :  { %363 = dma.vmem_to_hbm [thread:$0]  %s361_s11, 128, %s522_s6, [#allocation3]  }
 0x26b   :  { %435 = dma.done.wait [#allocation3], 128  }
 0x26c   :  { %436 = vsyncadd [#allocation3], 4294967168 }
 0x26d   :  { %367 = vsyncpa [#allocation3], 1 }

</bundles_post_ra>
